<compile_context>
chip_gen: v6e
topology: v6e:2x2x1
jax: 0.10.0
libtpu: 0.0.40
codegen_flags: <defaults>
</compile_context>

<pallas_src>
import jax
import jax.numpy as jnp
from jax.experimental import pallas as pl
from jax.experimental.pallas import tpu as pltpu


_LANE = 128
_TILE_COLS = 1024        # lane-dense slab width (8 full vregs wide)
_TILE_ROWS = 512         # max sublane tile -> (512, 1024) f32 = 2 MiB / buffer
_SMALL_N = 8 * _LANE     # below one (8,128) vreg's worth: plain JAX add


def _add_one_kernel(x_ref, o_ref):
    # Pure VPU elementwise op over the whole VMEM tile.
    o_ref[...] = x_ref[...] + jnp.asarray(1, dtype=o_ref.dtype)


def juanwnang_forward(x):
    """JAX/Pallas equivalent of juanwnang.forward: returns x + 1."""
    x = jnp.asarray(x)
    orig_shape = x.shape
    dtype = x.dtype
    n = x.size

    # Scalar / tiny inputs (the original script does `output = yang(1)`):
    # skip pallas_call entirely — launch + DMA overhead dwarfs the work.
    if n <= _SMALL_N:
        return x + jnp.asarray(1, dtype=dtype)

    # Flatten to a lane-dense (rows_p, 1024) slab, padding so the grid
    # divides evenly (no partial edge blocks to mask).
    flat = x.reshape(-1)
    rows = -(-n // _TILE_COLS)                      # ceil(n / 1024)
    if rows <= _TILE_ROWS:
        rows_p = -(-rows // 8) * 8                  # round up to sublane mult
        block_rows = rows_p                         # single row-block
    else:
        rows_p = -(-rows // _TILE_ROWS) * _TILE_ROWS
        block_rows = _TILE_ROWS
    padded_n = rows_p * _TILE_COLS
    if padded_n != n:
        flat = jnp.pad(flat, (0, padded_n - n))
    x2d = flat.reshape(rows_p, _TILE_COLS)

    grid = (rows_p // block_rows,)
    itemsize = jnp.dtype(dtype).itemsize

    out2d = pl.pallas_call(
        _add_one_kernel,
        out_shape=jax.ShapeDtypeStruct((rows_p, _TILE_COLS), dtype),
        grid=grid,
        in_specs=[pl.BlockSpec((block_rows, _TILE_COLS), lambda i: (i, 0))],
        out_specs=pl.BlockSpec((block_rows, _TILE_COLS), lambda i: (i, 0)),
        # The padded slab is a fresh intermediate, so it can be donated:
        # output reuses its HBM buffer (halves HBM footprint for big inputs).
        input_output_aliases={0: 0},
        cost_estimate=pl.CostEstimate(
            flops=padded_n,
            transcendentals=0,
            bytes_accessed=2 * padded_n * itemsize),
        compiler_params=pltpu.CompilerParams(
            dimension_semantics=("parallel",)),
    )(x2d)

    # Drop padding and restore the caller's shape.
    return out2d.reshape(-1)[:n].reshape(orig_shape)


if __name__ == "__main__":
    key = jax.random.PRNGKey(0)

    # Small tensor input (NCHW-like), analogous to typical nn.Module use.
    x = jax.random.normal(key, (2, 4, 16, 16), dtype=jnp.float32)
    out = jax.block_until_ready(juanwnang_forward(x))
    assert out.shape == x.shape and out.dtype == x.dtype
    assert jnp.allclose(out, x + 1.0)

    # Exercise the multi-block grid path (rows > _TILE_ROWS -> grid=(2,)).
    y = jax.random.normal(jax.random.PRNGKey(0), (1024, 1024), dtype=jnp.float32)
    out_y = jax.block_until_ready(juanwnang_forward(y))
    assert jnp.allclose(out_y, y + 1.0)

    # Scalar input, matching the original script's `output = yang(1)` usage
    # (takes the fast plain-JAX path).
    out_scalar = jax.block_until_ready(juanwnang_forward(jnp.float32(1)))
    assert jnp.allclose(out_scalar, 2.0)

    print("KERNEL_OK")
</pallas_src>

<mosaic_0001>
module attributes {stable_mosaic.version = 11 : i64} {
  func.func @_add_one_kernel(%arg0: i32, %arg1: memref<8x1024xf32, #tpu.memory_space<vmem>>, %arg2: memref<8x1024xf32, #tpu.memory_space<vmem>>) attributes {dimension_semantics = [#tpu.dimension_semantics<parallel>], iteration_bounds = array<i64: 1>, scalar_prefetch = 0 : i64, scratch_operands = 0 : i64, tpu.core_type = #tpu.core_type<tc>, window_params = [{transform_indices = @transform_0, window_bounds = array<i64: 8, 1024>}, {transform_indices = @transform_1, window_bounds = array<i64: 8, 1024>}]} {
    %c0 = arith.constant 0 : index
    %c0_0 = arith.constant 0 : index
    %0 = vector.load %arg1[%c0, %c0_0] : memref<8x1024xf32, #tpu.memory_space<vmem>>, vector<8x1024xf32>
    %cst = arith.constant 1.000000e+00 : f32
    %1 = vector.broadcast %cst : f32 to vector<8x1024xf32>
    %2 = arith.addf %0, %1 : vector<8x1024xf32>
    %c0_1 = arith.constant 0 : index
    %c0_2 = arith.constant 0 : index
    %3 = vector.load %arg2[%c0_1, %c0_2] : memref<8x1024xf32, #tpu.memory_space<vmem>>, vector<8x1024xf32>
    tpu.vector_store %arg2[%c0_1, %c0_2], %2 {strides = array<i32>} : memref<8x1024xf32, #tpu.memory_space<vmem>>, vector<8x1024xf32>,
    return
  }
  func.func @transform_0(%arg0: i32) -> (i32, i32) {
    %c0_i32 = arith.constant 0 : i32
    %c0_i32_0 = arith.constant 0 : i32
    return %arg0, %c0_i32 : i32, i32
  }
  func.func @transform_1(%arg0: i32) -> (i32, i32) {
    %c0_i32 = arith.constant 0 : i32
    %c0_i32_0 = arith.constant 0 : i32
    return %arg0, %c0_i32 : i32, i32
  }
}

</mosaic_0001>

<bundles_post_ra>
// kernel: tpu_custom_call.1
= control target key start
LH: loop header
LB: loop body
LE: loop exit
PB: predicated region body
PF: predicated region fallthrough
CT: control target
= control target key end

     0   :  { %6 = vsyncpa [#allocation3], 0  ;;  %s124_s0 = inlined_call_operand.hbm [shape: f32[8,1024], index: 0, kind: input, shape index: {}, may-alias: {0,1}]   ;;  %s125_s1 = inlined_call_operand.hbm [shape: f32[8,1024], index: 1, kind: output, shape index: {}, may-alias: {0,1}]  }
   0x1   :  { %7 = vsyncpa [#allocation4], 0  ;;  %s106_s6 = smov [#allocation2]  }
   0x2   :  { %s14_s7 = sshll.u32 %s106_s6, 4  ;;  %s15_s7 = int_to_ptr.vmem [resolvable:$true] %s14_s7 }
   0x3   :  { %s70_s8 = scalar_lea.vmem %s15_s7, 1024  ;;  %p75_p1 = scmp.lt.s32.totalorder %s15_s7, %s15_s7 }
   0x4   :  { %p71_p0 = scmp.ne.s32.totalorder %s15_s7, %s70_s8  ;;  %p76_p2 = scmp.lt.s32.totalorder %s70_s8, %s70_s8 }
   0x6   :  { %p77_p3 = por %p76_p2, %p75_p1 }
   0x8   :  { %p78_p4 = pnand %p77_p3, %p71_p0 }
   0xa   :  { %81 = shalt.err (!%p78_p4)
}
   0xb   :  { %17 = dma.hbm_to_vmem [thread:$0]  %s124_s0, 1024, %s15_s7, [#allocation3]  }
   0xc   :  { %102 = dma.done.wait [#allocation3], 1024  }
   0xd   :  { %103 = vsyncadd [#allocation3], 4294966272  ;;  %v21_v0 = vld [vmem:[#allocation2] sm:$0xff]  ;;  %v22_v1 = vld [vmem:[#allocation2 + $0x8] sm:$0xff]  ;;  %s107_s11 = smov [#allocation5]  }
   0xe   :  { %v23_v2 = vld [vmem:[#allocation2 + $0x10] sm:$0xff]  ;;  %s51_s12 = sshll.u32 %s107_s11, 4  ;;  %v29_v3 = vadd.f32 1.0, %v21_v0  ;;  %v30_v4 = vadd.f32 1.0, %v22_v1  ;;  %v24_v6 = vld [vmem:[#allocation2 + $0x18] sm:$0xff]  ;;  %v25_v7 = vld [vmem:[#allocation2 + $0x20] sm:$0xff]  ;;  %s52_s12 = int_to_ptr.vmem [resolvable:$true] %s51_s12 }
   0xf   :  { %v31_v5 = vadd.f32 1.0, %v23_v2  ;;  %v26_v8 = vld [vmem:[#allocation2 + $0x28] sm:$0xff]  ;;  %v32_v9 = vadd.f32 1.0, %v24_v6  ;;  %v33_v10 = vadd.f32 1.0, %v25_v7  ;;  %v27_v12 = vld [vmem:[#allocation2 + $0x30] sm:$0xff]  ;;  %v28_v13 = vld [vmem:[#allocation2 + $0x38] sm:$0xff]  ;;  %p87_p6 = scmp.lt.s32.totalorder %s52_s12, %s52_s12 }
  0x10   :  { %v34_v11 = vadd.f32 1.0, %v26_v8  ;;  %37 = vst [vmem:[#allocation5] sm:$0xff] %v29_v3  ;;  %38 = vst [vmem:[#allocation5 + $0x8] sm:$0xff] %v30_v4  ;;  %v35_v14 = vadd.f32 1.0, %v27_v12  ;;  %v36_v15 = vadd.f32 1.0, %v28_v13  ;;  %s82_s0 = scalar_lea.vmem %s52_s12, 1024 }
  0x11   :  { %39 = vst [vmem:[#allocation5 + $0x10] sm:$0xff] %v31_v5  ;;  %40 = vst [vmem:[#allocation5 + $0x18] sm:$0xff] %v32_v9  ;;  %p83_p5 = scmp.ne.s32.totalorder %s52_s12, %s82_s0  ;;  %p88_p7 = scmp.lt.s32.totalorder %s82_s0, %s82_s0 }
  0x12   :  { %41 = vst [vmem:[#allocation5 + $0x20] sm:$0xff] %v33_v10  ;;  %42 = vst [vmem:[#allocation5 + $0x28] sm:$0xff] %v34_v11 }
  0x13   :  { %43 = vst [vmem:[#allocation5 + $0x30] sm:$0xff] %v35_v14  ;;  %44 = vst [vmem:[#allocation5 + $0x38] sm:$0xff] %v36_v15  ;;  %p89_p8 = por %p88_p7, %p87_p6 }
  0x15   :  { %p90_p9 = pnand %p89_p8, %p83_p5 }
  0x17   :  { %93 = shalt.err (!%p90_p9)
}
  0x18   :  { %54 = dma.vmem_to_hbm [thread:$0]  %s52_s12, 1024, %s125_s1, [#allocation4]  }
  0x19   :  { %104 = dma.done.wait [#allocation4], 1024  }
  0x1a   :  { %105 = vsyncadd [#allocation4], 4294966272 }
  0x1b   :  { %58 = vsyncpa [#allocation3], 1 }
  0x1c   :  { %59 = vsyncpa [#allocation4], 1 }

</bundles_post_ra>
